<compile_context>
chip_gen: v7x
topology: tpu7x:2x2x1
jax: 0.10.0
libtpu: 0.0.40
codegen_flags: <defaults>
</compile_context>

<pallas_src>
import jax
import jax.numpy as jnp
from jax.experimental import pallas as pl
from jax.experimental.pallas import tpu as pltpu


def _layer_scale_kernel(x_ref, g_ref, o_ref):
    # x_ref: (tm, D), g_ref: (1, D) broadcast over rows, o_ref: (tm, D).
    # gamma stays f32; the product promotes, then casts to the output dtype.
    o_ref[...] = (x_ref[...] * g_ref[...]).astype(o_ref.dtype)


def _vmem_budget_bytes():
    """Per-call VMEM budget: safe on v5e/v6e (128 MiB) and v7x (64 MiB)."""
    try:
        cap = pltpu.get_tpu_info().vmem_capacity_bytes
    except Exception:
        cap = 64 * 1024 * 1024  # conservative fallback (v7x physical VMEM)
    return int(min(48 * 1024 * 1024, 0.75 * cap))


def layer_scale_forward(x, gamma, *, max_tile_m=1024):
    """y = x * gamma, gamma broadcast along the last dim.  x: (..., D), gamma: (D,)."""
    orig_shape = x.shape
    D = orig_shape[-1]
    assert gamma.shape == (D,), "gamma must have shape (dim,)"

    M = 1
    for s in orig_shape[:-1]:
        M *= s
    x2d = x.reshape(M, D)
    gamma_row = gamma.reshape(1, D)  # keep gamma's own (f32) dtype

    x_itemsize = jnp.dtype(x.dtype).itemsize
    g_itemsize = jnp.dtype(gamma.dtype).itemsize
    # Sublane multiple for the activation dtype: 8 (f32), 16 (bf16), 32 (i8/fp8).
    sub = max(8, 8 * (4 // x_itemsize))

    # Lane folding for small D: pack r rows into the lane dimension so the
    # streamed row is wide and lane-dense (unmasked vst) and there are fewer
    # grid steps.  Only when D is a multiple of 128 and r divides M exactly.
    if D % 128 == 0 and D < 512 and M > 1:
        r = max(1, 512 // D)
        while r > 1 and M % r != 0:
            r -= 1
        if r > 1:
            x2d = x2d.reshape(M // r, r * D)
            gamma_row = jnp.tile(gamma_row, (1, r))
            M, D = M // r, r * D

    # Budget-driven row tile: 2 double-buffered input tiles + 2 output tiles
    # per step, plus the resident gamma row and ~2 MiB headroom.
    budget = _vmem_budget_bytes()
    per_row_bytes = 4 * D * x_itemsize
    usable = max(per_row_bytes, budget - D * g_itemsize - (2 << 20))
    tm = min(max_tile_m, usable // per_row_bytes)
    tm = max(sub, (tm // sub) * sub)
    # Never larger than the (sublane-rounded) problem.
    tm = min(tm, pl.cdiv(M, sub) * sub)
    tm = max(sub, tm)
    # Prefer >= 2 grid steps when the problem allows so the "parallel" axis
    # can shard across both v7x TensorCores (harmless on 1-TC v5e/v6e).
    if pl.cdiv(M, tm) < 2 and M >= 2 * sub:
        tm = pl.cdiv(pl.cdiv(M, 2), sub) * sub

    grid = (pl.cdiv(M, tm),)

    cost = pl.CostEstimate(
        flops=M * D,
        transcendentals=0,
        bytes_accessed=2 * M * D * x_itemsize + D * g_itemsize,
    )

    out2d = pl.pallas_call(
        _layer_scale_kernel,
        out_shape=jax.ShapeDtypeStruct((M, D), x.dtype),
        grid_spec=pl.GridSpec(
            grid=grid,
            in_specs=[
                pl.BlockSpec((tm, D), lambda i: (i, 0)),  # streamed x rows
                pl.BlockSpec((1, D), lambda i: (0, 0)),   # resident gamma row
            ],
            out_specs=pl.BlockSpec((tm, D), lambda i: (i, 0)),
        ),
        compiler_params=pltpu.CompilerParams(
            dimension_semantics=("parallel",),
            vmem_limit_bytes=budget,
        ),
        cost_estimate=cost,
    )(x2d, gamma_row)

    return out2d.reshape(orig_shape)
    # TODO(synk): the `inplace=True` (x.mul_) variant has no JAX equivalent
    # (immutable arrays); the functional product is returned instead.


def _reference(x, gamma):
    return x * gamma


if __name__ == "__main__":
    # Small DiT-style shapes: batch=2, seq=16, dim=128 (lane-dense last dim).
    B, N, D = 2, 16, 128
    init_values = 1e-5

    key = jax.random.PRNGKey(0)
    kx, kg = jax.random.split(key, 2)

    x = jax.random.normal(kx, (B, N, D), dtype=jnp.float32)
    # Module init is init_values * ones(dim); perturb slightly so the test is
    # not a trivial constant scale.
    gamma = init_values * jnp.ones((D,), dtype=jnp.float32) \
        + 1e-3 * jax.random.normal(kg, (D,), dtype=jnp.float32)

    y = layer_scale_forward(x, gamma)
    y = jax.block_until_ready(y)

    y_ref = _reference(x, gamma)
    assert y.shape == (B, N, D)
    assert jnp.allclose(y, y_ref, atol=1e-6, rtol=1e-6), "mismatch vs reference"

    print("KERNEL_OK")
</pallas_src>

<mosaic_0001>
module attributes {stable_mosaic.version = 11 : i64} {
  func.func @_layer_scale_kernel(%arg0: i32, %arg1: memref<8x512xf32, #tpu.memory_space<vmem>>, %arg2: memref<1x512xf32, #tpu.memory_space<vmem>>, %arg3: memref<8x512xf32, #tpu.memory_space<vmem>>) attributes {dimension_semantics = [#tpu.dimension_semantics<parallel>], iteration_bounds = array<i64: 1>, scalar_prefetch = 0 : i64, scratch_operands = 0 : i64, tpu.core_type = #tpu.core_type<tc>, window_params = [{transform_indices = @transform_0, window_bounds = array<i64: 8, 512>}, {pipeline_mode = #tpu.pipeline_mode<synchronous>, transform_indices = @transform_1, window_bounds = array<i64: 1, 512>}, {transform_indices = @transform_2, window_bounds = array<i64: 8, 512>}]} {
    %c0 = arith.constant 0 : index
    %c0_0 = arith.constant 0 : index
    %0 = vector.load %arg1[%c0, %c0_0] : memref<8x512xf32, #tpu.memory_space<vmem>>, vector<8x512xf32>
    %c0_1 = arith.constant 0 : index
    %c0_2 = arith.constant 0 : index
    %1 = vector.load %arg2[%c0_1, %c0_2] : memref<1x512xf32, #tpu.memory_space<vmem>>, vector<1x512xf32>
    %2 = vector.broadcast %1 : vector<1x512xf32> to vector<8x512xf32>
    %3 = arith.mulf %0, %2 : vector<8x512xf32>
    %c0_3 = arith.constant 0 : index
    %c0_4 = arith.constant 0 : index
    %4 = vector.load %arg3[%c0_3, %c0_4] : memref<8x512xf32, #tpu.memory_space<vmem>>, vector<8x512xf32>
    tpu.vector_store %arg3[%c0_3, %c0_4], %3 {strides = array<i32>} : memref<8x512xf32, #tpu.memory_space<vmem>>, vector<8x512xf32>,
    return
  }
  func.func @transform_0(%arg0: i32) -> (i32, i32) {
    %c0_i32 = arith.constant 0 : i32
    %c0_i32_0 = arith.constant 0 : i32
    return %arg0, %c0_i32 : i32, i32
  }
  func.func @transform_1(%arg0: i32) -> (i32, i32) {
    %c0_i32 = arith.constant 0 : i32
    %c0_i32_0 = arith.constant 0 : i32
    %c0_i32_1 = arith.constant 0 : i32
    return %c0_i32, %c0_i32_0 : i32, i32
  }
  func.func @transform_2(%arg0: i32) -> (i32, i32) {
    %c0_i32 = arith.constant 0 : i32
    %c0_i32_0 = arith.constant 0 : i32
    return %arg0, %c0_i32 : i32, i32
  }
}

</mosaic_0001>

<bundles_post_ra>
// kernel: tpu_custom_call.1
= control target key start
LH: loop header
LB: loop body
LE: loop exit
PB: predicated region body
PF: predicated region fallthrough
CT: control target
= control target key end

     0   :  { %7 = vsyncpa [#allocation3], 0  ;;  %s215_s0 = inlined_call_operand.hbm [shape: f32[8,512], index: 0, kind: input, shape index: {}]   ;;  %s216_s1 = inlined_call_operand.hbm [shape: f32[1,512], index: 1, kind: input, shape index: {}]   ;;  %s217_s2 = inlined_call_operand.hbm [shape: f32[8,512], index: 2, kind: output, shape index: {}]  }
   0x1   :  { %8 = vsyncpa [#allocation6], 0 }
   0x2   :  { %9 = vsyncpa [#allocation4], 0  ;;  %s161_s9 = smov [#allocation2]   ;;  %s162_s11 = smov [#allocation5]  }
   0x3   :  { %s16_s10 = sshll.u32 %s161_s9, 4  ;;  %s26_s12 = sshll.u32 %s162_s11, 4  ;;  %s17_s10 = int_to_ptr.vmem [resolvable:$true] %s16_s10  ;;  %s27_s12 = int_to_ptr.vmem [resolvable:$true] %s26_s12 }
   0x4   :  { %s89_s15 = scalar_lea.hbm %s215_s0, 512 }
   0x5   :  { %p90_p0 = scmp.ne.s32.totalorder %s215_s0, %s89_s15  ;;  %p93_p1 = scmp.lt.u32.totalorder %s89_s15, %s215_s0 }
   0x7   :  { %p95_p2 = pnand %p93_p1, %p90_p0 }
   0x9   :  { %98 = shalt.err (!%p95_p2)
}
   0xa   :  { %s99_s20 = scalar_lea.vmem %s17_s10, 512  ;;  %p104_p4 = scmp.lt.s32.totalorder %s17_s10, %s17_s10 }
   0xb   :  { %p100_p3 = scmp.ne.s32.totalorder %s17_s10, %s99_s20  ;;  %p105_p5 = scmp.lt.s32.totalorder %s99_s20, %s99_s20 }
   0xd   :  { %p106_p6 = por %p105_p5, %p104_p4 }
   0xf   :  { %p107_p7 = pnand %p106_p6, %p100_p3 }
  0x11   :  { %110 = shalt.err (!%p107_p7)
}
  0x12   :  { %19 = dma.hbm_to_vmem [thread:$0]  %s215_s0, 512, %s17_s10, [#allocation3]  }
  0x13   :  { %s111_s25 = scalar_lea.hbm %s216_s1, 64 }
  0x14   :  { %p112_p8 = scmp.ne.s32.totalorder %s216_s1, %s111_s25  ;;  %p115_p9 = scmp.lt.u32.totalorder %s111_s25, %s216_s1 }
  0x16   :  { %p117_p10 = pnand %p115_p9, %p112_p8 }
  0x18   :  { %120 = shalt.err (!%p117_p10)
}
  0x19   :  { %s121_s30 = scalar_lea.vmem %s27_s12, 64  ;;  %p126_p12 = scmp.lt.s32.totalorder %s27_s12, %s27_s12 }
  0x1a   :  { %p122_p11 = scmp.ne.s32.totalorder %s27_s12, %s121_s30  ;;  %p127_p13 = scmp.lt.s32.totalorder %s121_s30, %s121_s30 }
  0x1c   :  { %p128_p0 = por %p127_p13, %p126_p12 }
  0x1e   :  { %p129_p1 = pnand %p128_p0, %p122_p11 }
  0x20   :  { %132 = shalt.err (!%p129_p1)
}
  0x21   :  { %29 = dma.hbm_to_vmem [thread:$0]  %s216_s1, 64, %s27_s12, [#allocation6]  }
  0x22   :  { %155 = dma.done.wait [#allocation3], 512  }
  0x23   :  { %156 = vsyncadd [#allocation3], 4294966784 }
  0x24   :  { %157 = dma.done.wait [#allocation6], 64  }
  0x25   :  { %158 = vsyncadd [#allocation6], 4294967232  ;;  %v42_v0 = vlaneseq  ;;  %v36_v6 = vld [vmem:[#allocation2] sm:$0xff]  ;;  %v37_v8 = vld [vmem:[#allocation2 + $0x8] sm:$0xff]  ;;  %s163_s4 = smov [#allocation7]  }
  0x26   :  { %v40_v7 = vld [vmem:[#allocation5] sm:$0xf]  ;;  %s76_s5 = sshll.u32 %s163_s4, 4  ;;  %v38_v11 = vld [vmem:[#allocation2 + $0x10] sm:$0xff]  ;;  %v39_v13 = vld [vmem:[#allocation2 + $0x18] sm:$0xff]  ;;  %s77_s5 = int_to_ptr.vmem [resolvable:$true] %s76_s5 }
  0x27   :  { %v43_v1 = vshrl.u32 %v42_v0, 7  ;;  %s133_s1 = scalar_lea.vmem %s77_s5, 512  ;;  %p138_p3 = scmp.lt.s32.totalorder %s77_s5, %s77_s5 }
  0x28   :  { %p134_p2 = scmp.ne.s32.totalorder %s77_s5, %s133_s1  ;;  %p139_p4 = scmp.lt.s32.totalorder %s133_s1, %s133_s1 }
  0x29   :  { %v44_v2 = vsub.s32 0, %v43_v1  ;;  %v48_v3 = vsub.s32 1, %v43_v1  ;;  %v52_v4 = vsub.s32 2, %v43_v1  ;;  %v56_v5 = vsub.s32 3, %v43_v1 }
  0x2a   :  { %p140_p5 = por %p139_p4, %p138_p3 }
  0x2b   :  { %v45_v9 = vrot.slane %v40_v7, %v44_v2  ;;  %v49_v10 = vrot.slane %v40_v7, %v48_v3  ;;  %v53_v12 = vrot.slane %v40_v7, %v52_v4  ;;  %v57_v14 = vrot.slane %v40_v7, %v56_v5 }
  0x2c   :  { %p141_p6 = pnand %p140_p5, %p134_p2 }
  0x2d   :  { %v62_v15 = vmul.f32 %v45_v9, %v36_v6  ;;  %v63_v16 = vmul.f32 %v49_v10, %v37_v8  ;;  %v64_v17 = vmul.f32 %v53_v12, %v38_v11  ;;  %v65_v18 = vmul.f32 %v57_v14, %v39_v13 }
  0x2f   :  { %66 = vst [vmem:[#allocation7] sm:$0xff] %v62_v15  ;;  %67 = vst [vmem:[#allocation7 + $0x8] sm:$0xff] %v63_v16 }
  0x30   :  { %68 = vst [vmem:[#allocation7 + $0x10] sm:$0xff] %v64_v17  ;;  %69 = vst [vmem:[#allocation7 + $0x18] sm:$0xff] %v65_v18 }
  0x31   :  { %144 = shalt.err (!%p141_p6)
}
  0x32   :  { %s145_s8 = scalar_lea.hbm %s217_s2, 512 }
  0x33   :  { %p146_p7 = scmp.ne.s32.totalorder %s217_s2, %s145_s8  ;;  %p149_p8 = scmp.lt.u32.totalorder %s145_s8, %s217_s2 }
  0x35   :  { %p151_p9 = pnand %p149_p8, %p146_p7 }
  0x37   :  { %154 = shalt.err (!%p151_p9)
}
  0x38   :  { %79 = dma.vmem_to_hbm [thread:$0]  %s77_s5, 512, %s217_s2, [#allocation4]  }
  0x39   :  { %159 = dma.done.wait [#allocation4], 512  }
  0x3a   :  { %160 = vsyncadd [#allocation4], 4294966784 }
  0x3b   :  { %83 = vsyncpa [#allocation3], 1 }
  0x3c   :  { %84 = vsyncpa [#allocation6], 1 }
  0x3d   :  { %85 = vsyncpa [#allocation4], 1 }

</bundles_post_ra>
